<compile_context>
chip_gen: v5e
topology: v5e:2x2
jax: 0.10.0
libtpu: 0.0.40
codegen_flags: <defaults>
</compile_context>

<pallas_src>
import functools

import jax
import jax.numpy as jnp
from jax.experimental import pallas as pl
from jax.experimental.pallas import tpu as pltpu


def _round_up(a, b):
    return ((a + b - 1) // b) * b


def _poly_kernel(z_ref, ut_ref, beta_ref, out_ref, s_acc_ref, *, poly_order, rank):
    """z_ref: (TB, TK) VMEM; ut_ref: (NCOLS, TK) VMEM (C folded in, transposed);
    beta_ref: (1,) f32 SMEM; out_ref: (1, 1, TB) f32 VMEM;
    s_acc_ref: (NCOLS, TB) f32 VMEM scratch holding the partial dot products."""
    k = pl.program_id(1)

    @pl.when(k == 0)
    def _init():
        s_acc_ref[...] = jnp.zeros_like(s_acc_ref)

    # Hot path: all (z · C_j*U_jn[:, r]) dot products at once on the MXU,
    # with the batch on the lane axis (NT matmul, flash-attention QK^T form).
    s_acc_ref[...] += jax.lax.dot_general(
        ut_ref[...], z_ref[...],
        dimension_numbers=(((1,), (1,)), ((), ())),
        preferred_element_type=jnp.float32)              # (NCOLS, TB) f32

    @pl.when(k == pl.num_programs(1) - 1)
    def _finish():
        # Per-order CP products on lane-dense (rank, TB) slabs, one sublane
        # reduction, one lane-dense (1, TB) store.
        total = None
        off = 0
        for j in range(poly_order):
            prod = s_acc_ref[off:off + rank, :]          # C[j] already folded in
            for n in range(1, j + 1):
                prod = prod * s_acc_ref[off + n * rank:off + (n + 1) * rank, :]
            total = prod if total is None else total + prod
            off += (j + 1) * rank
        out_ref[0] = jnp.sum(total, axis=0, keepdims=True) + beta_ref[0]


def _fold_c_into_u(u_all, c, *, poly_order, rank):
    """Scale the n=0 factor block of every order j by C[j] (f32, (D, ncols))."""
    ncols = u_all.shape[1]
    scales = jnp.ones((ncols,), jnp.float32)
    off = 0
    for j in range(poly_order):
        scales = scales.at[off:off + rank].set(c[j])
        off += (j + 1) * rank
    return u_all.astype(jnp.float32) * scales[None, :]


def _vmem_limit_bytes():
    try:
        info = pltpu.get_tpu_info()
        cap = int(getattr(info, "vmem_capacity_bytes", 64 * 1024 * 1024))
    except Exception:
        cap = 64 * 1024 * 1024
    # ~half of physical VMEM: ~64 MiB on v5e/v6e (128 MiB phys), ~32 MiB on v7x.
    return int(min(96 * 1024 * 1024, max(32 * 1024 * 1024, cap // 2)))


def poly_tensor_regression_forward(x, u_all, c, beta, *, poly_order, rank,
                                   reg_lambda_c=0.01,
                                   compute_dtype=jnp.bfloat16,
                                   block_b=512, block_d=None):
    """x: (B, C, H, W); u_all: (D, Ncols) CP factors packed column-wise,
    Ncols = sum_j (j+1)*rank; c: (poly_order,); beta: (1,).
    Returns (preds (B,) f32, reg_loss scalar)."""
    bsz = x.shape[0]
    z = x.reshape(bsz, -1).astype(compute_dtype)          # (B, D), torch x.view(-1)
    d = z.shape[1]
    ncols = u_all.shape[1]
    assert ncols == sum((j + 1) * rank for j in range(poly_order))

    # Fold C into U, transpose so the kernel's matmul puts batch on lanes.
    u_t = _fold_c_into_u(u_all, c, poly_order=poly_order, rank=rank).T
    u_t = u_t.astype(compute_dtype)                       # (ncols, D)
    beta_f32 = beta.astype(jnp.float32)

    itemsize = jnp.dtype(compute_dtype).itemsize
    vmem_limit = _vmem_limit_bytes()
    vmem_budget = (vmem_limit * 3) // 4

    # ---- batch tiling: 16-aligned; >=2 grid steps when batch allows (megacore).
    b16 = _round_up(bsz, 16)
    tb = min(_round_up(block_b, 16), b16)
    if b16 >= 32:
        tb = min(tb, _round_up((b16 + 1) // 2, 16))
    b_pad = _round_up(bsz, tb)
    num_b = b_pad // tb

    # ---- feature (K) tiling: fit [2x Z block + U block(s) + scratch] in VMEM.
    ncols_pad = _round_up(ncols, 8)
    fixed = ncols_pad * tb * 4 + 8 * tb * 4                # s_acc scratch + out rows
    if block_d is None:
        per_col_single = (2 * tb + ncols_pad) * itemsize
        if fixed + per_col_single * d <= vmem_budget:
            block_d = d
        else:
            per_col_tiled = (2 * tb + 2 * ncols_pad) * itemsize
            block_d = ((vmem_budget - fixed) // per_col_tiled) // 128 * 128
            block_d = max(128, block_d)
    if block_d >= d:
        tk, d_pad, num_k = d, d, 1
    else:
        tk = max(128, (block_d // 128) * 128)
        d_pad = _round_up(d, tk)
        num_k = d_pad // tk

    # ---- zero padding: padded rows just produce beta (sliced off below);
    # padded feature columns contribute nothing to the dot products.
    if b_pad != bsz or d_pad != d:
        z = jnp.pad(z, ((0, b_pad - bsz), (0, d_pad - d)))
    if d_pad != d:
        u_t = jnp.pad(u_t, ((0, 0), (0, d_pad - d)))

    kernel = functools.partial(_poly_kernel, poly_order=poly_order, rank=rank)

    # Resident U^T: single-buffer it when its block never changes (num_k == 1).
    u_index_map = lambda i, k: (0, k)
    if num_k == 1:
        try:
            u_spec = pl.BlockSpec((ncols, tk), u_index_map,
                                  pipeline_mode=pl.Buffered(1))
        except TypeError:                                  # Pallas w/o pipeline_mode
            u_spec = pl.BlockSpec((ncols, tk), u_index_map)
    else:
        u_spec = pl.BlockSpec((ncols, tk), u_index_map)

    u_bytes = d_pad * ncols * itemsize * (1 if num_k == 1 else num_b)
    cost = pl.CostEstimate(
        flops=2 * b_pad * d_pad * ncols + 2 * b_pad * ncols,
        transcendentals=0,
        bytes_accessed=b_pad * d_pad * itemsize + u_bytes + b_pad * 4)

    preds = pl.pallas_call(
        kernel,
        out_shape=jax.ShapeDtypeStruct((num_b, 1, tb), jnp.float32),
        grid_spec=pltpu.PrefetchScalarGridSpec(
            num_scalar_prefetch=0,
            grid=(num_b, num_k),
            in_specs=[
                pl.BlockSpec((tb, tk), lambda i, k: (i, k)),        # Z: streamed
                u_spec,                                             # U^T: resident
                pl.BlockSpec(memory_space=pltpu.MemorySpace.SMEM),  # beta scalar
            ],
            out_specs=pl.BlockSpec((1, 1, tb), lambda i, k: (i, 0, 0)),
            scratch_shapes=[pltpu.VMEM((ncols, tb), jnp.float32)],
        ),
        compiler_params=pltpu.CompilerParams(
            dimension_semantics=("parallel", "arbitrary"),
            vmem_limit_bytes=vmem_limit),
        cost_estimate=cost,
    )(z, u_t, beta_f32)

    # Scalar regularizer (only the C-term is returned by the original forward).
    reg_loss = reg_lambda_c * jnp.sum(jnp.abs(c))
    return preds.reshape(-1)[:bsz], reg_loss


def _reference_folded(z, u_folded, beta_f32, *, poly_order, rank):
    """Pure-JAX reference on identical (C-folded) inputs."""
    s = jnp.dot(z, u_folded, preferred_element_type=jnp.float32)
    total = None
    off = 0
    for j in range(poly_order):
        prod = s[:, off:off + rank]
        for n in range(1, j + 1):
            prod = prod * s[:, off + n * rank:off + (n + 1) * rank]
        total = prod if total is None else total + prod
        off += (j + 1) * rank
    return jnp.sum(total, axis=-1) + beta_f32[0]


def _reference_unfolded(x, u_all, c, beta, *, poly_order, rank):
    """Original per-order formula in f32: beta + sum_j C[j]*sum_r prod_n (z·U_jn[:,r])."""
    bsz = x.shape[0]
    z = x.reshape(bsz, -1).astype(jnp.float32)
    s = jnp.dot(z, u_all.astype(jnp.float32), preferred_element_type=jnp.float32)
    result = jnp.zeros((bsz,), jnp.float32) + beta[0]
    off = 0
    for j in range(poly_order):
        prod = s[:, off:off + rank]
        for n in range(1, j + 1):
            prod = prod * s[:, off + n * rank:off + (n + 1) * rank]
        off += (j + 1) * rank
        result = result + c[j] * jnp.sum(prod, axis=-1)
    return result


if __name__ == "__main__":
    # Module hyper-params (defaults from __init__)
    decomp_rank = 3
    poly_order = 5
    reg_lambda_c = 0.01

    # Small input consistent with forward: (B, ...) tensor, flattened per sample.
    B, C, H, W = 2, 4, 16, 16
    D = C * H * W

    key = jax.random.PRNGKey(0)
    kx, kc, kb, ku = jax.random.split(key, 4)

    x = jax.random.normal(kx, (B, C, H, W), dtype=jnp.float32)
    c = jax.random.normal(kc, (poly_order,), dtype=jnp.float32)     # C[j] scalars
    beta = jax.random.normal(kb, (1,), dtype=jnp.float32)           # beta

    # CP factors U[j][n] of shape (D, R), packed column-wise into one matrix.
    n_factor_blocks = sum(j + 1 for j in range(poly_order))
    u_keys = jax.random.split(ku, n_factor_blocks)
    u_blocks = [jax.random.normal(u_keys[t], (D, decomp_rank), dtype=jnp.float32) * 0.05
                for t in range(n_factor_blocks)]
    u_all = jnp.concatenate(u_blocks, axis=1)    # (D, sum_j (j+1)*R) = (D, 45)

    # --- run 1: default path (bf16 stream, auto tiling -> single K step here) ---
    preds, reg_loss = poly_tensor_regression_forward(
        x, u_all, c, beta, poly_order=poly_order, rank=decomp_rank,
        reg_lambda_c=reg_lambda_c)
    preds = jax.block_until_ready(preds)
    reg_loss = jax.block_until_ready(reg_loss)
    assert preds.shape == (B,)

    z_bf16 = x.reshape(B, -1).astype(jnp.bfloat16)
    u_bf16 = _fold_c_into_u(u_all, c, poly_order=poly_order,
                            rank=decomp_rank).astype(jnp.bfloat16)
    ref_preds = _reference_folded(z_bf16, u_bf16, beta.astype(jnp.float32),
                                  poly_order=poly_order, rank=decomp_rank)
    assert jnp.allclose(preds, ref_preds, rtol=1e-3, atol=1e-3), (preds, ref_preds)

    # --- run 2: force the K-tiled (feature-blocked) accumulation path ---
    preds_kt, _ = poly_tensor_regression_forward(
        x, u_all, c, beta, poly_order=poly_order, rank=decomp_rank,
        reg_lambda_c=reg_lambda_c, block_d=256)
    preds_kt = jax.block_until_ready(preds_kt)
    assert jnp.allclose(preds_kt, ref_preds, rtol=1e-3, atol=1e-3), (preds_kt, ref_preds)

    # --- fold-C param prep preserves the original per-order math (pure f32 JAX) ---
    folded_f32 = _reference_folded(
        x.reshape(B, -1).astype(jnp.float32),
        _fold_c_into_u(u_all, c, poly_order=poly_order, rank=decomp_rank),
        beta.astype(jnp.float32), poly_order=poly_order, rank=decomp_rank)
    unfolded_f32 = _reference_unfolded(x, u_all, c, beta,
                                       poly_order=poly_order, rank=decomp_rank)
    assert jnp.allclose(folded_f32, unfolded_f32, rtol=1e-3, atol=1e-3)

    # --- regularizer (only the C-term is returned by the original forward) ---
    assert jnp.allclose(reg_loss, reg_lambda_c * jnp.sum(jnp.abs(c)),
                        rtol=1e-6, atol=1e-7)

    # TODO(synk): self.network (MLP over decomp_rank) is constructed in __init__ but
    # never used in forward; regularization_loss_w is computed then discarded by the
    # original forward (only the C-term is returned), so neither is implemented here.
    print("KERNEL_OK")
</pallas_src>

<mosaic_0001>
module attributes {stable_mosaic.version = 11 : i64} {
  func.func @_poly_kernel(%arg0: i32, %arg1: i32, %arg2: memref<16x1024xbf16, #tpu.memory_space<vmem>>, %arg3: memref<45x1024xbf16, #tpu.memory_space<vmem>>, %arg4: memref<1xf32, #tpu.memory_space<smem>>, %arg5: memref<1x1x16xf32, #tpu.memory_space<vmem>>, %arg6: memref<45x16xf32, #tpu.memory_space<vmem>>) attributes {dimension_semantics = [#tpu.dimension_semantics<parallel>, #tpu.dimension_semantics<arbitrary>], iteration_bounds = array<i64: 1, 1>, scalar_prefetch = 0 : i64, scratch_operands = 1 : i64, tpu.core_type = #tpu.core_type<tc>, window_params = [{transform_indices = @transform_0, window_bounds = array<i64: 16, 1024>}, {pipeline_mode = #tpu.pipeline_mode<synchronous>, transform_indices = @transform_1, window_bounds = array<i64: 45, 1024>}, {transform_indices = @transform_2, window_bounds = array<i64: 1>}, {transform_indices = @transform_3, window_bounds = array<i64: 1, 1, 16>}]} {
    %c0_i32 = arith.constant 0 : i32
    %0 = arith.cmpi eq, %arg1, %c0_i32 : i32
    %1 = arith.extui %0 : i1 to i32
    %c0_i32_0 = arith.constant 0 : i32
    %2 = arith.cmpi ne, %1, %c0_i32_0 : i32
    scf.if %2 {
      %cst_10 = arith.constant 0.000000e+00 : f32
      %12 = vector.broadcast %cst_10 : f32 to vector<45x16xf32>
      %c0_11 = arith.constant 0 : index
      %c0_12 = arith.constant 0 : index
      %13 = vector.load %arg6[%c0_11, %c0_12] : memref<45x16xf32, #tpu.memory_space<vmem>>, vector<45x16xf32>
      tpu.vector_store %arg6[%c0_11, %c0_12], %12 {strides = array<i32>} : memref<45x16xf32, #tpu.memory_space<vmem>>, vector<45x16xf32>,
    } else {
    }
    %c0 = arith.constant 0 : index
    %c0_1 = arith.constant 0 : index
    %3 = vector.load %arg6[%c0, %c0_1] : memref<45x16xf32, #tpu.memory_space<vmem>>, vector<45x16xf32>
    %c0_2 = arith.constant 0 : index
    %c0_3 = arith.constant 0 : index
    %4 = vector.load %arg3[%c0_2, %c0_3] : memref<45x1024xbf16, #tpu.memory_space<vmem>>, vector<45x1024xbf16>
    %c0_4 = arith.constant 0 : index
    %c0_5 = arith.constant 0 : index
    %5 = vector.load %arg2[%c0_4, %c0_5] : memref<16x1024xbf16, #tpu.memory_space<vmem>>, vector<16x1024xbf16>
    %cst = arith.constant dense<0.000000e+00> : vector<45x16xf32>
    %6 = tpu.matmul %4, %5, %cst {dimension_numbers = #tpu.dot_dimension_numbers<[1], [1], [0], [0], [0, 0, 1, 0], [], []>} : vector<45x1024xbf16>, vector<16x1024xbf16>, vector<45x16xf32> -> vector<45x16xf32>
    %7 = arith.addf %3, %6 : vector<45x16xf32>
    %c0_6 = arith.constant 0 : index
    %c0_7 = arith.constant 0 : index
    %8 = vector.load %arg6[%c0_6, %c0_7] : memref<45x16xf32, #tpu.memory_space<vmem>>, vector<45x16xf32>
    tpu.vector_store %arg6[%c0_6, %c0_7], %7 {strides = array<i32>} : memref<45x16xf32, #tpu.memory_space<vmem>>, vector<45x16xf32>,
    %c0_i32_8 = arith.constant 0 : i32
    %9 = arith.cmpi eq, %arg1, %c0_i32_8 : i32
    %10 = arith.extui %9 : i1 to i32
    %c0_i32_9 = arith.constant 0 : i32
    %11 = arith.cmpi ne, %10, %c0_i32_9 : i32
    scf.if %11 {
      %c0_10 = arith.constant 0 : index
      %c0_11 = arith.constant 0 : index
      %12 = vector.load %arg6[%c0_10, %c0_11] : memref<45x16xf32, #tpu.memory_space<vmem>>, vector<3x16xf32>
      %c3 = arith.constant 3 : index
      %c0_12 = arith.constant 0 : index
      %13 = vector.load %arg6[%c3, %c0_12] : memref<45x16xf32, #tpu.memory_space<vmem>>, vector<3x16xf32>
      %c6 = arith.constant 6 : index
      %c0_13 = arith.constant 0 : index
      %14 = vector.load %arg6[%c6, %c0_13] : memref<45x16xf32, #tpu.memory_space<vmem>>, vector<3x16xf32>
      %15 = arith.mulf %13, %14 : vector<3x16xf32>
      %16 = arith.addf %12, %15 : vector<3x16xf32>
      %c9 = arith.constant 9 : index
      %c0_14 = arith.constant 0 : index
      %17 = vector.load %arg6[%c9, %c0_14] : memref<45x16xf32, #tpu.memory_space<vmem>>, vector<3x16xf32>
      %c12 = arith.constant 12 : index
      %c0_15 = arith.constant 0 : index
      %18 = vector.load %arg6[%c12, %c0_15] : memref<45x16xf32, #tpu.memory_space<vmem>>, vector<3x16xf32>
      %19 = arith.mulf %17, %18 : vector<3x16xf32>
      %c15 = arith.constant 15 : index
      %c0_16 = arith.constant 0 : index
      %20 = vector.load %arg6[%c15, %c0_16] : memref<45x16xf32, #tpu.memory_space<vmem>>, vector<3x16xf32>
      %21 = arith.mulf %19, %20 : vector<3x16xf32>
      %22 = arith.addf %16, %21 : vector<3x16xf32>
      %c18 = arith.constant 18 : index
      %c0_17 = arith.constant 0 : index
      %23 = vector.load %arg6[%c18, %c0_17] : memref<45x16xf32, #tpu.memory_space<vmem>>, vector<3x16xf32>
      %c21 = arith.constant 21 : index
      %c0_18 = arith.constant 0 : index
      %24 = vector.load %arg6[%c21, %c0_18] : memref<45x16xf32, #tpu.memory_space<vmem>>, vector<3x16xf32>
      %25 = arith.mulf %23, %24 : vector<3x16xf32>
      %c24 = arith.constant 24 : index
      %c0_19 = arith.constant 0 : index
      %26 = vector.load %arg6[%c24, %c0_19] : memref<45x16xf32, #tpu.memory_space<vmem>>, vector<3x16xf32>
      %27 = arith.mulf %25, %26 : vector<3x16xf32>
      %c27 = arith.constant 27 : index
      %c0_20 = arith.constant 0 : index
      %28 = vector.load %arg6[%c27, %c0_20] : memref<45x16xf32, #tpu.memory_space<vmem>>, vector<3x16xf32>
      %29 = arith.mulf %27, %28 : vector<3x16xf32>
      %30 = arith.addf %22, %29 : vector<3x16xf32>
      %c30 = arith.constant 30 : index
      %c0_21 = arith.constant 0 : index
      %31 = vector.load %arg6[%c30, %c0_21] : memref<45x16xf32, #tpu.memory_space<vmem>>, vector<3x16xf32>
      %c33 = arith.constant 33 : index
      %c0_22 = arith.constant 0 : index
      %32 = vector.load %arg6[%c33, %c0_22] : memref<45x16xf32, #tpu.memory_space<vmem>>, vector<3x16xf32>
      %33 = arith.mulf %31, %32 : vector<3x16xf32>
      %c36 = arith.constant 36 : index
      %c0_23 = arith.constant 0 : index
      %34 = vector.load %arg6[%c36, %c0_23] : memref<45x16xf32, #tpu.memory_space<vmem>>, vector<3x16xf32>
      %35 = arith.mulf %33, %34 : vector<3x16xf32>
      %c39 = arith.constant 39 : index
      %c0_24 = arith.constant 0 : index
      %36 = vector.load %arg6[%c39, %c0_24] : memref<45x16xf32, #tpu.memory_space<vmem>>, vector<3x16xf32>
      %37 = arith.mulf %35, %36 : vector<3x16xf32>
      %c42 = arith.constant 42 : index
      %c0_25 = arith.constant 0 : index
      %38 = vector.load %arg6[%c42, %c0_25] : memref<45x16xf32, #tpu.memory_space<vmem>>, vector<3x16xf32>
      %39 = arith.mulf %37, %38 : vector<3x16xf32>
      %40 = arith.addf %30, %39 : vector<3x16xf32>
      %cst_26 = arith.constant dense<0.000000e+00> : vector<16xf32>
      %41 = vector.multi_reduction <add>, %40, %cst_26 [0] : vector<3x16xf32> to vector<16xf32>
      %42 = vector.shape_cast %41 : vector<16xf32> to vector<1x16xf32>
      %c0_27 = arith.constant 0 : index
      %43 = memref.load %arg4[%c0_27] : memref<1xf32, #tpu.memory_space<smem>>
      %44 = vector.broadcast %43 : f32 to vector<1x16xf32>
      %45 = arith.addf %42, %44 : vector<1x16xf32>
      %c0_28 = arith.constant 0 : index
      %c0_29 = arith.constant 0 : index
      %c0_30 = arith.constant 0 : index
      %46 = vector.load %arg5[%c0_28, %c0_29, %c0_30] : memref<1x1x16xf32, #tpu.memory_space<vmem>>, vector<1x1x16xf32>
      %47 = vector.shape_cast %46 : vector<1x1x16xf32> to vector<1x16xf32>
      %48 = vector.shape_cast %45 : vector<1x16xf32> to vector<1x1x16xf32>
      tpu.vector_store %arg5[%c0_28, %c0_29, %c0_30], %48 {strides = array<i32>} : memref<1x1x16xf32, #tpu.memory_space<vmem>>, vector<1x1x16xf32>,
    } else {
    }
    return
  }
  func.func @transform_0(%arg0: i32, %arg1: i32) -> (i32, i32) {
    %c0_i32 = arith.constant 0 : i32
    return %arg0, %arg1 : i32, i32
  }
  func.func @transform_1(%arg0: i32, %arg1: i32) -> (i32, i32) {
    %c0_i32 = arith.constant 0 : i32
    %c0_i32_0 = arith.constant 0 : i32
    return %c0_i32, %arg1 : i32, i32
  }
  func.func @transform_2(%arg0: i32, %arg1: i32) -> i32 {
    %c0_i32 = arith.constant 0 : i32
    %c0_i32_0 = arith.constant 0 : i32
    return %c0_i32 : i32
  }
  func.func @transform_3(%arg0: i32, %arg1: i32) -> (i32, i32, i32) {
    %c0_i32 = arith.constant 0 : i32
    %c0_i32_0 = arith.constant 0 : i32
    %c0_i32_1 = arith.constant 0 : i32
    return %arg0, %c0_i32, %c0_i32_0 : i32, i32, i32
  }
}

</mosaic_0001>

<bundles_post_ra>
// kernel: tpu_custom_call.1
= control target key start
LH: loop header
LB: loop body
LE: loop exit
PB: predicated region body
PF: predicated region fallthrough
CT: control target
= control target key end

     0   :  { %9 = vsyncpa [#allocation5], 0  ;;  %s831_s0 = inlined_call_operand.hbm [shape: bf16[16,1024], index: 0, kind: input, shape index: {}]   ;;  %s832_s1 = inlined_call_operand.hbm [shape: bf16[45,1024], index: 1, kind: input, shape index: {}]   ;;  %s833_s2 = inlined_call_operand.<no memory space> [shape: f32[1], index: 2, kind: input, shape index: {}]   ;;  %s834_s3 = inlined_call_operand.hbm [shape: f32[1,1,16], index: 3, kind: output, shape index: {}]  }
   0x1   :  { %10 = vsyncpa [#allocation8], 0 }
   0x2   :  { %11 = vsyncpa [#allocation6], 0  ;;  %s16_s14 = sshll.u32 %s831_s0, 4  ;;  %s772_s15 = smov [#allocation4]   ;;  %s17_s14 = int_to_ptr.hbm [resolvable:$true] %s16_s14 }
   0x3   :  { %s18_s16 = sshll.u32 %s772_s15, 4  ;;  %s29_s19 = sshll.u32 %s832_s1, 4  ;;  %s19_s16 = int_to_ptr.vmem [resolvable:$true] %s18_s16  ;;  %s30_s19 = int_to_ptr.hbm [resolvable:$true] %s29_s19 }
   0x4   :  { %s773_s20 = smov 512   ;;  %s774_s21 = smov 32  }
   0x5   :  { %24 = dma.hbm_to_vmem [thread:$0]  %s17_s14, 1024, %s19_s16, [#allocation5], %s773_s20, %s773_s20, %s774_s21  }
   0x6   :  { %s775_s22 = smov [#allocation7]  }
   0x7   :  { %s31_s23 = sshll.u32 %s775_s22, 4  ;;  %s32_s23 = int_to_ptr.vmem [resolvable:$true] %s31_s23 }
   0x8   :  { %37 = dma.hbm_to_vmem [thread:$0]  %s30_s19, 3072, %s32_s23, [#allocation8], %s773_s20, %s773_s20, %s774_s21  }
   0x9   :  { %766 = dma.done.wait [#allocation5], 1024  }
   0xa   :  { %767 = vsyncadd [#allocation5], 4294966272 }
   0xb   :  { %768 = dma.done.wait [#allocation8], 3072  }
   0xc   :  { %769 = vsyncadd [#allocation8], 4294964224  ;;  %v626_v0 = vld [vmem:[#allocation4] sm:$0xf]  ;;  %v680_v2 = vld [vmem:[#allocation4 + $0x4] sm:$0xf] }
   0xd   :  { %v684_v1 = vld [vmem:[#allocation4 + $0x1c] sm:$0xf0]  ;;  %v628_v4 = vld [vmem:[#allocation4 + $0x20] sm:$0xf0]  ;;  %v634_v5 = vld [vmem:[#allocation4 + $0x8] sm:$0xf] }
   0xe   :  { %v627_v3 = vor.u32 %v684_v1, %v626_v0  ;;  %v685_v6 = vld [vmem:[#allocation4 + $0x24] sm:$0xf0]  ;;  %v631_v7 = vor.u32 %v680_v2, %v628_v4  ;;  %v681_v9 = vld [vmem:[#allocation4 + $0xc] sm:$0xf]  ;;  %v530_v11 = vld [vmem:[#allocation7] sm:$0xf] }
   0xf   :  { %v635_v8 = vor.u32 %v685_v6, %v634_v5  ;;  %v636_v10 = vld [vmem:[#allocation4 + $0x28] sm:$0xf0]  ;;  %v660_v13 = vld [vmem:[#allocation7 + $0x1c] sm:$0xf0]  ;;  %v656_v14 = vld [vmem:[#allocation7 + $0x4] sm:$0xf] }
  0x10   :  { %266 = vmatpush.bf16.xpose.msra.mxu0 %v627_v3  ;;  %v639_v12 = vor.u32 %v681_v9, %v636_v10  ;;  %v532_v15 = vld [vmem:[#allocation7 + $0x20] sm:$0xf0]  ;;  %290 = vmatpush.bf16.xpose.msra.mxu1 %v631_v7  ;;  %v538_v16 = vld [vmem:[#allocation7 + $0x8] sm:$0xf]  ;;  %v657_v18 = vld [vmem:[#allocation7 + $0xc] sm:$0xf]  ;;  %v531_v22 = vor.u32 %v660_v13, %v530_v11 }
  0x11   :  { %314 = vmatpush.bf16.xpose.msra.mxu2 %v635_v8  ;;  %v661_v17 = vld [vmem:[#allocation7 + $0x24] sm:$0xf0]  ;;  %v540_v19 = vld [vmem:[#allocation7 + $0x28] sm:$0xf0]  ;;  %v650_v20 = vld [vmem:[#allocation4 + $0x18] sm:$0xf]  ;;  %v535_v27 = vor.u32 %v656_v14, %v532_v15 }
  0x12   :  { %338 = vmatpush.bf16.xpose.msra.mxu3 %v639_v12  ;;  %v687_v21 = vld [vmem:[#allocation4 + $0x34] sm:$0xf0]  ;;  %v642_v24 = vld [vmem:[#allocation4 + $0x10] sm:$0xf]  ;;  %v683_v26 = vld [vmem:[#allocation4 + $0x1c] sm:$0xf]  ;;  %v539_v28 = vor.u32 %v661_v17, %v538_v16  ;;  %v543_v33 = vor.u32 %v657_v18, %v540_v19 }
  0x13   :  { %v651_v23 = vor.u32 %v687_v21, %v650_v20  ;;  %v686_v25 = vld [vmem:[#allocation4 + $0x2c] sm:$0xf0]  ;;  %v652_v30 = vld [vmem:[#allocation4 + $0x38] sm:$0xf0]  ;;  %v682_v31 = vld [vmem:[#allocation4 + $0x14] sm:$0xf] }
  0x14   :  { %v643_v29 = vor.u32 %v686_v25, %v642_v24  ;;  %v644_v32 = vld [vmem:[#allocation4 + $0x30] sm:$0xf0]  ;;  %v655_v34 = vor.u32 %v683_v26, %v652_v30  ;;  %v562_v36 = vld [vmem:[#allocation7 + $0x40] sm:$0xf]  ;;  %v664_v38 = vld [vmem:[#allocation7 + $0x44] sm:$0xf] }
  0x15   :  { %v647_v35 = vor.u32 %v682_v31, %v644_v32  ;;  %v668_v37 = vld [vmem:[#allocation7 + $0x5c] sm:$0xf0]  ;;  %v564_v39 = vld [vmem:[#allocation7 + $0x60] sm:$0xf0]  ;;  %v570_v40 = vld [vmem:[#allocation7 + $0x48] sm:$0xf] }
  0x16   :  { %v669_v41 = vld [vmem:[#allocation7 + $0x64] sm:$0xf0]  ;;  %v665_v42 = vld [vmem:[#allocation7 + $0x4c] sm:$0xf]  ;;  %v563_v44 = vor.u32 %v668_v37, %v562_v36  ;;  %v567_v45 = vor.u32 %v664_v38, %v564_v39  ;;  %v594_v48 = vld [vmem:[#allocation7 + $0x80] sm:$0xf] }
  0x17   :  { %267 = vmatmul.bf16.vlgmr.msra.gmra.mxu0 %v531_v22  ;;  %291 = vmatmul.bf16.vlgmr.msra.gmra.mxu1 %v535_v27  ;;  %v572_v43 = vld [vmem:[#allocation7 + $0x68] sm:$0xf0]  ;;  %v571_v46 = vor.u32 %v669_v41, %v570_v40  ;;  %v676_v49 = vld [vmem:[#allocation7 + $0x9c] sm:$0x70]  ;;  %v672_v50 = vld [vmem:[#allocation7 + $0x84] sm:$0xf] }
  0x18   :  { %362 = vmatpush.bf16.xpose.msrb.mxu0 %v643_v29  ;;  %315 = vmatmul.bf16.vlgmr.msra.gmra.mxu2 %v539_v28  ;;  %v575_v47 = vor.u32 %v665_v42, %v572_v43  ;;  %v596_v51 = vld [vmem:[#allocation7 + $0xa0] sm:$0x70]  ;;  %v602_v52 = vld [vmem:[#allocation7 + $0x88] sm:$0xf]  ;;  %v673_v54 = vld [vmem:[#allocation7 + $0x8c] sm:$0xf]  ;;  %v595_v56 = vor.u32 %v676_v49, %v594_v48 }
  0x19   :  { %410 = vmatpush.bf16.xpose.msrb.mxu2 %v651_v23  ;;  %339 = vmatmul.bf16.vlgmr.msra.gmra.mxu3 %v543_v33  ;;  %v677_v53 = vld [vmem:[#allocation7 + $0xa4] sm:$0x70]  ;;  %v604_v55 = vld [vmem:[#allocation7 + $0xa8] sm:$0x70]  ;;  %v599_v57 = vor.u32 %v672_v50, %v596_v51  ;;  %v546_v60 = vld [vmem:[#allocation7 + $0x10] sm:$0xf] }
  0x1a   :  { %434 = vmatpush.bf16.xpose.msrb.mxu3 %v655_v34  ;;  %386 = vmatpush.bf16.xpose.msrb.mxu1 %v647_v35  ;;  %v603_v58 = vor.u32 %v677_v53, %v602_v52  ;;  %v607_v59 = vor.u32 %v673_v54, %v604_v55  ;;  %v662_v61 = vld [vmem:[#allocation7 + $0x2c] sm:$0xf0]  ;;  %v658_v62 = vld [vmem:[#allocation7 + $0x14] sm:$0xf]  ;;  %v554_v0 = vld [vmem:[#allocation7 + $0x18] sm:$0xf] }
  0x1b   :  { %v548_v63 = vld [vmem:[#allocation7 + $0x30] sm:$0xf0]  ;;  %v663_v1 = vld [vmem:[#allocation7 + $0x34] sm:$0xf0]  ;;  %v659_v2 = vld [vmem:[#allocation7 + $0x1c] sm:$0xf]  ;;  %v547_v4 = vor.u32 %v662_v61, %v546_v60 }
  0x1c   :  { %v556_v3 = vld [vmem:[#allocation7 + $0x38] sm:$0xf0]  ;;  %v551_v5 = vor.u32 %v658_v62, %v548_v63  ;;  %v555_v6 = vor.u32 %v663_v1, %v554_v0  ;;  %v578_v8 = vld [vmem:[#allocation7 + $0x50] sm:$0xf]  ;;  %v666_v10 = vld [vmem:[#allocation7 + $0x54] sm:$0xf] }
  0x1d   :  { %v559_v7 = vor.u32 %v659_v2, %v556_v3  ;;  %v670_v9 = vld [vmem:[#allocation7 + $0x6c] sm:$0xf0]  ;;  %v580_v11 = vld [vmem:[#allocation7 + $0x70] sm:$0xf0]  ;;  %v586_v12 = vld [vmem:[#allocation7 + $0x58] sm:$0xf] }
  0x1e   :  { %v671_v13 = vld [vmem:[#allocation7 + $0x74] sm:$0xf0]  ;;  %v667_v14 = vld [vmem:[#allocation7 + $0x5c] sm:$0xf]  ;;  %v579_v16 = vor.u32 %v670_v9, %v578_v8  ;;  %v583_v17 = vor.u32 %v666_v10, %v580_v11  ;;  %v610_v20 = vld [vmem:[#allocation7 + $0x90] sm:$0xf] }
  0x1f   :  { %v588_v15 = vld [vmem:[#allocation7 + $0x78] sm:$0xf0]  ;;  %v587_v18 = vor.u32 %v671_v13, %v586_v12  ;;  %v678_v21 = vld [vmem:[#allocation7 + $0xac] sm:$0x70]  ;;  %v674_v22 = vld [vmem:[#allocation7 + $0x94] sm:$0xf] }
  0x20   :  { %v591_v19 = vor.u32 %v667_v14, %v588_v15  ;;  %v612_v23 = vld [vmem:[#allocation7 + $0xb0] sm:$0x70]  ;;  %v618_v24 = vld [vmem:[#allocation7 + $0x98] sm:$0xf]  ;;  %v675_v26 = vld [vmem:[#allocation7 + $0x9c] sm:$0xf]  ;;  %v611_v28 = vor.u32 %v678_v21, %v610_v20 }
  0x21   :  { %v679_v25 = vld [vmem:[#allocation7 + $0xb4] sm:$0x70]  ;;  %v620_v27 = vld [vmem:[#allocation7 + $0xb8] sm:$0x70]  ;;  %v615_v29 = vor.u32 %v674_v22, %v612_v23  ;;  %vm53_vm0 = vcmask 130048   ;;  %v776_v42 = vmov 0.0  }
  0x22   :  { %v619_v30 = vor.u32 %v679_v25, %v618_v24  ;;  %v623_v31 = vor.u32 %v675_v26, %v620_v27  ;;  %54 = vst.msk [vmem:[#allocation2] sm:$0xff] %vm53_vm0, %v776_v42  ;;  %vm59_vm1 = vcmask 126976   ;;  %vm497_vm2 = vcmask 124928   ;;  %s777_s24 = smov [#allocation9]   ;;  %s517_s28 = sshll.u32 %s834_s3, 4  ;;  %s518_s28 = int_to_ptr.hbm [resolvable:$true] %s517_s28 }
  0x23   :  { %55 = vst.msk [vmem:[#allocation2 + $0x8] sm:$0xff] %vm53_vm0, %v776_v42  ;;  %s515_s25 = sshll.u32 %s777_s24, 4  ;;  %vm508_vm3 = vcmask 122880   ;;  %s516_s25 = int_to_ptr.vmem [resolvable:$true] %s515_s25 }
  0x24   :  { %56 = vst.msk [vmem:[#allocation2 + $0x10] sm:$0xff] %vm53_vm0, %v776_v42 }
  0x25   :  { %57 = vst.msk [vmem:[#allocation2 + $0x18] sm:$0xff] %vm53_vm0, %v776_v42 }
  0x26   :  { %58 = vst.msk [vmem:[#allocation2 + $0x20] sm:$0xff] %vm53_vm0, %v776_v42 }
  0x27   :  { %272 = vmatmul.bf16.gmra.mxu0 %v563_v44  ;;  %296 = vmatmul.bf16.gmra.mxu1 %v567_v45  ;;  %60 = vst.msk [vmem:[#allocation2 + $0x28] sm:$0x1f] %vm59_vm1, %v776_v42 }
  0x28   :  { %320 = vmatmul.bf16.gmra.mxu2 %v571_v46 }
  0x29   :  { %344 = vmatmul.bf16.gmra.mxu3 %v575_v47 }
  0x2a   :  { %v62_v20 = vld [vmem:[#allocation2 + $0x8] sm:$0xff] }
  0x37   :  { %277 = vmatmul.bf16.gmra.mxu0 %v595_v56  ;;  %301 = vmatmul.bf16.gmra.mxu1 %v599_v57 }
  0x38   :  { %325 = vmatmul.bf16.gmra.mxu2 %v603_v58 }
  0x39   :  { %349 = vmatmul.bf16.gmra.mxu3 %v607_v59 }
  0x47   :  { %363 = vmatmul.bf16.vlgmr.msrb.gmra.mxu0 %v547_v4  ;;  %387 = vmatmul.bf16.vlgmr.msrb.gmra.mxu1 %v551_v5 }
  0x48   :  { %411 = vmatmul.bf16.vlgmr.msrb.gmra.mxu2 %v555_v6 }
  0x49   :  { %435 = vmatmul.bf16.vlgmr.msrb.gmra.mxu3 %v559_v7  ;;  %v61_v7 = vld [vmem:[#allocation2] sm:$0xff] }
  0x57   :  { %368 = vmatmul.bf16.gmra.mxu0 %v579_v16  ;;  %392 = vmatmul.bf16.gmra.mxu1 %v583_v17 }
  0x58   :  { %416 = vmatmul.bf16.gmra.mxu2 %v587_v18 }
  0x59   :  { %440 = vmatmul.bf16.gmra.mxu3 %v591_v19 }
  0x67   :  { %373 = vmatmul.bf16.gmra.mxu0 %v611_v28  ;;  %397 = vmatmul.bf16.gmra.mxu1 %v615_v29 }
  0x68   :  { %421 = vmatmul.bf16.gmra.mxu2 %v619_v30 }
  0x69   :  { %445 = vmatmul.bf16.gmra.mxu3 %v623_v31 }
  0x94   :  { %v268_v32 = vpop.f32.mrf.mxu0  ;;  %v292_v33 = vpop.f32.mrf.mxu1 }
  0x95   :  { %v293_v55 = vadd.f32 %v292_v33, %v268_v32  ;;  %v63_v33 = vld [vmem:[#allocation2 + $0x10] sm:$0xff] }
  0x9b   :  { %v316_v34 = vpop.f32.mrf.mxu2 }
  0x9c   :  { %v340_v35 = vpop.f32.mrf.mxu3  ;;  %v270_v36 = vpop.f32.mrf.mxu0  ;;  %v317_v56 = vadd.f32 %v316_v34, %v293_v55 }
  0x9d   :  { %v294_v37 = vpop.f32.mrf.mxu1 }
  0x9e   :  { %v341_v58 = vadd.f32 %v340_v35, %v317_v56  ;;  %v295_v62 = vadd.f32 %v294_v37, %v270_v36 }
  0xa3   :  { %v318_v38 = vpop.f32.mrf.mxu2 }
  0xa4   :  { %v342_v39 = vpop.f32.mrf.mxu3  ;;  %v273_v40 = vpop.f32.mrf.mxu0  ;;  %v319_v0 = vadd.f32 %v318_v38, %v295_v62 }
  0xa5   :  { %v297_v41 = vpop.f32.mrf.mxu1 }
  0xa6   :  { %v343_v3 = vadd.f32 %v342_v39, %v319_v0  ;;  %v298_v9 = vadd.f32 %v297_v41, %v273_v40 }
  0xab   :  { %v321_v43 = vpop.f32.mrf.mxu2 }
  0xac   :  { %v345_v44 = vpop.f32.mrf.mxu3  ;;  %v275_v45 = vpop.f32.mrf.mxu0  ;;  %v322_v12 = vadd.f32 %v321_v43, %v298_v9 }
  0xad   :  { %v299_v46 = vpop.f32.mrf.mxu1 }
  0xae   :  { %v346_v16 = vadd.f32 %v345_v44, %v322_v12  ;;  %v300_v22 = vadd.f32 %v299_v46, %v275_v45  ;;  %v64_v46 = vld [vmem:[#allocation2 + $0x18] sm:$0xff] }
  0xb3   :  { %v323_v47 = vpop.f32.mrf.mxu2 }
  0xb4   :  { %v347_v48 = vpop.f32.mrf.mxu3  ;;  %v278_v49 = vpop.f32.mrf.mxu0  ;;  %v324_v25 = vadd.f32 %v323_v47, %v300_v22 }
  0xb5   :  { %v302_v50 = vpop.f32.mrf.mxu1 }
  0xb6   :  { %v348_v29 = vadd.f32 %v347_v48, %v324_v25  ;;  %v303_v35 = vadd.f32 %v302_v50, %v278_v49 }
  0xbb   :  { %v326_v51 = vpop.f32.mrf.mxu2 }
  0xbc   :  { %v350_v52 = vpop.f32.mrf.mxu3  ;;  %v809_v53 = vpop.f32.mrf.mxu0  ;;  %v327_v38 = vadd.f32 %v326_v51, %v303_v35 }
  0xbd   :  { %v304_v54 = vpop.f32.mrf.mxu1 }
  0xbe   :  { %v351_v42 = vadd.f32 %v350_v52, %v327_v38  ;;  %v305_v47 = vadd.f32 %v304_v54, %v809_v53 }
  0xc3   :  { %v811_v57 = vpop.f32.mrf.mxu2 }
  0xc4   :  { %v813_v59 = vpop.f32.mrf.mxu3  ;;  %v364_v60 = vpop.f32.mrf.mxu0  ;;  %v329_v49 = vadd.f32 %v811_v57, %v305_v47 }
  0xc5   :  { %v388_v61 = vpop.f32.mrf.mxu1  ;;  %v365_v63 = vadd.f32 %v364_v60, %v341_v58 }
  0xc6   :  { %v353_v60 = vadd.f32 %v813_v59, %v329_v49 }
  0xc7   :  { %v389_v1 = vadd.f32 %v388_v61, %v365_v63  ;;  %v65_v63 = vld [vmem:[#allocation2 + $0x20] sm:$0xff] }
  0xcb   :  { %v412_v2 = vpop.f32.mrf.mxu2 }
  0xcc   :  { %v413_v4 = vadd.f32 %v412_v2, %v389_v1  ;;  %v436_v5 = vpop.f32.mrf.mxu3  ;;  %v366_v6 = vpop.f32.mrf.mxu0 }
  0xcd   :  { %v390_v8 = vpop.f32.mrf.mxu1  ;;  %v367_v11 = vadd.f32 %v366_v6, %v343_v3 }
  0xce   :  { %v437_v10 = vadd.f32 %v436_v5, %v413_v4  ;;  %v66_v4 = vld [vmem:[#allocation2 + $0x28] sm:$0x1f] }
  0xcf   :  { %v391_v14 = vadd.f32 %v390_v8, %v367_v11 }
  0xd0   :  { %v451_v13 = vadd.f32 %v437_v10, %v61_v7 }
  0xd2   :  { %458 = vst.msk [vmem:[#allocation2] sm:$0xff] %vm53_vm0, %v451_v13 }
  0xd3   :  { %v414_v15 = vpop.f32.mrf.mxu2 }
  0xd4   :  { %v415_v17 = vadd.f32 %v414_v15, %v391_v14  ;;  %v438_v18 = vpop.f32.mrf.mxu3  ;;  %v369_v19 = vpop.f32.mrf.mxu0 }
  0xd5   :  { %v393_v21 = vpop.f32.mrf.mxu1  ;;  %v370_v24 = vadd.f32 %v369_v19, %v346_v16 }
  0xd6   :  { %v439_v23 = vadd.f32 %v438_v18, %v415_v17 }
  0xd7   :  { %v394_v27 = vadd.f32 %v393_v21, %v370_v24 }
  0xd8   :  { %v452_v26 = vadd.f32 %v439_v23, %v62_v20 }
  0xd9   :  { %v469_v16 = vld [vmem:[#allocation2 + $0x3] sm:$0x7]  ;;  %v468_v23 = vld [vmem:[#allocation2] sm:$0x7] }
  0xda   :  { %459 = vst.msk [vmem:[#allocation2 + $0x8] sm:$0xff] %vm53_vm0, %v452_v26 }
  0xdb   :  { %v417_v28 = vpop.f32.mrf.mxu2 }
  0xdc   :  { %v418_v30 = vadd.f32 %v417_v28, %v394_v27  ;;  %v441_v31 = vpop.f32.mrf.mxu3  ;;  %v371_v32 = vpop.f32.mrf.mxu0 }
  0xdd   :  { %v395_v34 = vpop.f32.mrf.mxu1  ;;  %v372_v37 = vadd.f32 %v371_v32, %v348_v29 }
  0xde   :  { %v442_v36 = vadd.f32 %v441_v31, %v418_v30 }
  0xdf   :  { %v396_v40 = vadd.f32 %v395_v34, %v372_v37 }
  0xe0   :  { %v453_v39 = vadd.f32 %v442_v36, %v63_v33 }
  0xe1   :  { %v470_v59 = vld [vmem:[#allocation2 + $0x6] sm:$0x7]  ;;  %v473_v10 = vld [vmem:[#allocation2 + $0x9] sm:$0x7]  ;;  %v474_v11 = vld [vmem:[#allocation2 + $0xc] sm:$0x7] }
  0xe2   :  { %460 = vst.msk [vmem:[#allocation2 + $0x10] sm:$0xff] %vm53_vm0, %v453_v39  ;;  %v471_v18 = vmul.f32 %v470_v59, %v469_v16  ;;  %v475_v19 = vmul.f32 %v474_v11, %v473_v10 }
  0xe3   :  { %v419_v41 = vpop.f32.mrf.mxu2 }
  0xe4   :  { %v420_v43 = vadd.f32 %v419_v41, %v396_v40  ;;  %v443_v44 = vpop.f32.mrf.mxu3  ;;  %v374_v45 = vpop.f32.mrf.mxu0  ;;  %v472_v26 = vadd.f32 %v471_v18, %v468_v23 }
  0xe5   :  { %v375_v55 = vadd.f32 %v374_v45, %v351_v42  ;;  %v398_v56 = vpop.f32.mrf.mxu1  ;;  %v506_v42 = vstv %s833_s2 }
  0xe6   :  { %v444_v48 = vadd.f32 %v443_v44, %v420_v43 }
  0xe7   :  { %v399_v51 = vadd.f32 %v398_v56, %v375_v55 }
  0xe8   :  { %v454_v50 = vadd.f32 %v444_v48, %v64_v46 }
  0xe9   :  { %v479_v7 = vld [vmem:[#allocation2 + $0x12] sm:$0x7]  ;;  %v480_v8 = vld [vmem:[#allocation2 + $0x15] sm:$0x7]  ;;  %v476_v17 = vld [vmem:[#allocation2 + $0xf] sm:$0x7] }
  0xea   :  { %461 = vst.msk [vmem:[#allocation2 + $0x18] sm:$0xff] %vm53_vm0, %v454_v50  ;;  %v481_v15 = vmul.f32 %v480_v8, %v479_v7  ;;  %v477_v22 = vmul.f32 %v476_v17, %v475_v19 }
  0xeb   :  { %v422_v58 = vpop.f32.mrf.mxu2 }
  0xec   :  { %v423_v61 = vadd.f32 %v422_v58, %v399_v51  ;;  %v446_v52 = vpop.f32.mrf.mxu3  ;;  %v376_v62 = vpop.f32.mrf.mxu0  ;;  %v478_v30 = vadd.f32 %v477_v22, %v472_v26 }
  0xed   :  { %v377_v1 = vadd.f32 %v376_v62, %v353_v60  ;;  %v400_v53 = vpop.f32.mrf.mxu1 }
  0xee   :  { %v447_v0 = vadd.f32 %v446_v52, %v423_v61 }
  0xef   :  { %v401_v54 = vadd.f32 %v400_v53, %v377_v1 }
  0xf0   :  { %v455_v2 = vadd.f32 %v447_v0, %v65_v63 }
  0xf1   :  { %v482_v12 = vld [vmem:[#allocation2 + $0x18] sm:$0x7]  ;;  %v484_v24 = vld [vmem:[#allocation2 + $0x1b] sm:$0x7] }
  0xf2   :  { %462 = vst.msk [vmem:[#allocation2 + $0x20] sm:$0xff] %vm53_vm0, %v455_v2  ;;  %v483_v20 = vmul.f32 %v482_v12, %v481_v15 }
  0xf3   :  { %v424_v3 = vpop.f32.mrf.mxu2 }
  0xf4   :  { %v425_v57 = vadd.f32 %v424_v3, %v401_v54  ;;  %v448_v5 = vpop.f32.mrf.mxu3  ;;  %v485_v27 = vmul.f32 %v484_v24, %v483_v20 }
  0xf6   :  { %v449_v6 = vadd.f32 %v448_v5, %v425_v57  ;;  %v486_v33 = vadd.f32 %v485_v27, %v478_v30 }
  0xf8   :  { %v456_v9 = vadd.f32 %v449_v6, %v66_v4 }
  0xf9   :  { %v487_v13 = vld [vmem:[#allocation2 + $0x1e] sm:$0x7]  ;;  %v488_v14 = vld [vmem:[#allocation2 + $0x21] sm:$0x7]  ;;  %v490_v25 = vld [vmem:[#allocation2 + $0x24] sm:$0x7] }
  0xfa   :  { %464 = vst.msk [vmem:[#allocation2 + $0x28] sm:$0x1f] %vm59_vm1, %v456_v9  ;;  %v489_v21 = vmul.f32 %v488_v14, %v487_v13 }
  0xfc   :  { %v491_v28 = vmul.f32 %v490_v25, %v489_v21 }
 0x101   :  { %v492_v29 = vld [vmem:[#allocation2 + $0x27] sm:$0x7]  ;;  %v494_v32 = vld [vmem:[#allocation2 + $0x2a] sm:$0x7] }
 0x102   :  { %v493_v31 = vmul.f32 %v492_v29, %v491_v28 }
 0x104   :  { %v495_v34 = vmul.f32 %v494_v32, %v493_v31 }
 0x106   :  { %v496_v35 = vadd.f32 %v495_v34, %v486_v33 }
 0x108   :  { %v498_v36 = vsel %vm497_vm2, %v496_v35, 0.0 }
 0x109   :  { %v499_v37 = vrot.slane %v498_v36, 4 }
 0x10b   :  { %v500_v38 = vadd.f32 %v499_v37, %v498_v36 }
 0x10d   :  { %v501_v39 = vrot.slane %v500_v38, 2 }
 0x10f   :  { %v502_v40 = vadd.f32 %v501_v39, %v500_v38 }
 0x111   :  { %v503_v41 = vrot.slane %v502_v40, 1 }
 0x113   :  { %v504_v43 = vadd.f32 %v503_v41, %v502_v40 }
 0x115   :  { %v507_v44 = vadd.f32 %v506_v42, %v504_v43 }
 0x117   :  { %509 = vst.msk [vmem:[#allocation9] sm:$0x1] %vm508_vm3, %v507_v44 }
 0x118   :  { %520 = dma.vmem_to_hbm [thread:$0]  %s516_s25, 16, %s518_s28, [#allocation6]  }
 0x119   :  { %770 = dma.done.wait [#allocation6], 16  }
 0x11a   :  { %771 = vsyncadd [#allocation6], 4294967280 }
 0x11b   :  { %525 = vsyncpa [#allocation5], 1 }
 0x11c   :  { %526 = vsyncpa [#allocation8], 1 }
 0x11d   :  { %527 = vsyncpa [#allocation6], 1 }

</bundles_post_ra>
